<compile_context>
chip_gen: v7x
topology: tpu7x:2x2x1
jax: 0.10.0
libtpu: 0.0.40
codegen_flags: <defaults>
</compile_context>

<pallas_src>
import functools
import math

import jax
import jax.numpy as jnp
from jax.experimental import pallas as pl
from jax.experimental.pallas import tpu as pltpu

_INV_SQRT2 = 0.7071067811865476
_BN_EPS = 1e-5


def _gelu_exact(h):
    # Exact (erf-based) GELU, matching torch.nn.functional.gelu default.
    # erf via Abramowitz & Stegun 7.1.26 (|abs err| ~1.5e-7, below f32 noise).
    # TODO(synk): switch to jax.lax.erf once its Mosaic lowering is guaranteed
    # across target JAX versions (would save ~15 VPU ops/element).
    u = h * _INV_SQRT2
    au = jnp.abs(u)
    t = pl.reciprocal(1.0 + 0.3275911 * au, approx=False)
    poly = t * (0.254829592 + t * (-0.284496736 + t * (1.421413741
             + t * (-1.453152027 + t * 1.061405429))))
    erf_abs = 1.0 - poly * jnp.exp(-au * au)
    erf_u = jnp.where(u >= 0.0, erf_abs, -erf_abs)
    return 0.5 * h * (1.0 + erf_u)


# ---------------------------------------------------------------------------
# Pass 1: per-channel sum / sum-of-squares (single pass over x).
# ---------------------------------------------------------------------------
def bn_stats_kernel(x_ref, sum_ref, sq_ref):
    # x_ref: (NB, C, L) batch tile; (C, 1) outputs accumulate across the grid.
    @pl.when(pl.program_id(0) == 0)
    def _():
        sum_ref[...] = jnp.zeros_like(sum_ref)
        sq_ref[...] = jnp.zeros_like(sq_ref)

    x = x_ref[...].astype(jnp.float32)
    xs = jnp.sum(x, axis=0)        # (C, L)
    xq = jnp.sum(x * x, axis=0)    # (C, L)
    sum_ref[...] += jnp.sum(xs, axis=1, keepdims=True)
    sq_ref[...] += jnp.sum(xq, axis=1, keepdims=True)


# ---------------------------------------------------------------------------
# Pass 2: fused (scale/shift BN) -> GELU -> Conv1d (im2col + one matmul each).
# ---------------------------------------------------------------------------
def convblock_kernel(scale_ref, shift_ref, x_ref, w_ref, b_ref, o_ref, im_ref):
    # scale/shift: (C, 1)   x_ref: (NB, C, L)   w_ref: (Co, K*C)   b_ref: (Co, 1)
    # o_ref: (NB, Co, L)    im_ref: (K*C, L) VMEM scratch (im2col buffer)
    NB, C, L = x_ref.shape
    K = im_ref.shape[0] // C
    pad = K // 2

    scale = scale_ref[...]
    shift = shift_ref[...]
    w = w_ref[...]
    bias = b_ref[...]

    # Boundary masks per tap, hoisted out of the batch loop (JAX does not CSE
    # the broadcasts, so build them once).
    pos = jax.lax.broadcasted_iota(jnp.int32, (C, L), 1)
    masks = []
    for t in range(K):
        d = t - pad
        if d == 0:
            masks.append(None)
        elif d > 0:
            masks.append(pos < L - d)
        else:
            masks.append(pos >= -d)

    for n in range(NB):  # static unroll over the batch tile
        # BatchNorm folded to per-channel scale/shift (2 VPU ops/element).
        h = x_ref[n].astype(jnp.float32) * scale + shift
        h = _gelu_exact(h)

        # Build im2col RHS with XLU rolls + boundary masks (no unaligned slices,
        # no zero-concatenate -> no lane relayout copies).
        for t in range(K):
            d = t - pad  # tap t reads h[:, l + d], zero outside [0, L)
            if d == 0:
                tap = h
            else:
                tap = pltpu.roll(h, shift=(-d) % L, axis=1)
                tap = jnp.where(masks[t], tap, 0.0)
            im_ref[t * C:(t + 1) * C, :] = tap

        # One MXU matmul over the folded (K*C) contraction; lane-dense store.
        acc = jnp.dot(w, im_ref[...], preferred_element_type=jnp.float32)
        o_ref[n] = (acc + bias).astype(o_ref.dtype)


def _pick_batch_tile(N, C, Co, L):
    # Largest divisor of N (capped) whose double-buffered input/output tiles
    # stay well inside the scoped-VMEM budget; amortises per-grid-step cost.
    budget = 8 * 1024 * 1024
    per_elem = 2 * (C + Co) * L * 4  # x + out tiles, double-buffered, f32
    cap = max(1, min(8, budget // max(per_elem, 1)))
    nb = 1
    for cand in range(1, N + 1):
        if cand <= cap and N % cand == 0:
            nb = cand
    return nb


@functools.partial(jax.jit, static_argnames=("kernel_size",))
def conv_block(x, gamma, beta, w_oik, b, *, kernel_size):
    """x: (N, C, L); w_oik: (Co, C, K) as in torch Conv1d.weight; returns (N, Co, L)."""
    N, C, L = x.shape
    Co = w_oik.shape[0]
    K = kernel_size
    # TODO(synk): even kernel_size gives output length L+1 in torch; only the
    # odd-K ('same' length) path is implemented here.
    assert K % 2 == 1, "only odd kernel_size supported"

    NB = _pick_batch_tile(N, C, Co, L)
    grid = (N // NB,)

    # ---- pass 1: BN batch statistics (training-mode, biased variance) ----
    sums, sqs = pl.pallas_call(
        bn_stats_kernel,
        out_shape=(jax.ShapeDtypeStruct((C, 1), jnp.float32),
                   jax.ShapeDtypeStruct((C, 1), jnp.float32)),
        grid=grid,
        in_specs=[pl.BlockSpec((NB, C, L), lambda n: (n, 0, 0))],
        out_specs=(pl.BlockSpec((C, 1), lambda n: (0, 0)),
                   pl.BlockSpec((C, 1), lambda n: (0, 0))),
        compiler_params=pltpu.CompilerParams(dimension_semantics=("arbitrary",)),
    )(x)

    cnt = jnp.float32(N * L)
    mean = sums / cnt
    var = jnp.maximum(sqs / cnt - mean * mean, 0.0)  # biased (training-mode) var
    scale = gamma.reshape(C, 1).astype(jnp.float32) * jax.lax.rsqrt(var + _BN_EPS)
    shift = beta.reshape(C, 1).astype(jnp.float32) - mean * scale

    # ---- weights reshaped for im2col contraction: W2[o, t*C + c] = w[o, c, t] ----
    w2 = jnp.transpose(w_oik, (0, 2, 1)).reshape(Co, K * C).astype(jnp.float32)
    b2 = b.reshape(Co, 1).astype(jnp.float32)

    cost = pl.CostEstimate(
        flops=2 * N * Co * K * C * L + 12 * N * C * L,
        transcendentals=N * C * L,
        bytes_accessed=4 * (N * C * L + N * Co * L + Co * K * C + 2 * C + Co),
    )

    # ---- pass 2: fused BN-apply + GELU + conv, pipelined & parallel over batch ----
    return pl.pallas_call(
        convblock_kernel,
        out_shape=jax.ShapeDtypeStruct((N, Co, L), x.dtype),
        grid=grid,
        in_specs=[
            pl.BlockSpec((C, 1), lambda n: (0, 0)),          # scale
            pl.BlockSpec((C, 1), lambda n: (0, 0)),          # shift
            pl.BlockSpec((NB, C, L), lambda n: (n, 0, 0)),   # x batch tile
            pl.BlockSpec((Co, K * C), lambda n: (0, 0)),     # conv weights (im2col)
            pl.BlockSpec((Co, 1), lambda n: (0, 0)),         # conv bias
        ],
        out_specs=pl.BlockSpec((NB, Co, L), lambda n: (n, 0, 0)),
        scratch_shapes=[pltpu.VMEM((K * C, L), jnp.float32)],
        compiler_params=pltpu.CompilerParams(
            dimension_semantics=("parallel",),
            vmem_limit_bytes=32 * 1024 * 1024,
        ),
        cost_estimate=cost,
    )(scale, shift, x, w2, b2)


def conv_block_reference(x, gamma, beta, w_oik, b, kernel_size):
    """Pure-JAX reference mirroring the torch forward pass (training-mode BN)."""
    mean = jnp.mean(x, axis=(0, 2), keepdims=True)
    var = jnp.mean((x - mean) ** 2, axis=(0, 2), keepdims=True)
    h = (x - mean) / jnp.sqrt(var + _BN_EPS) * gamma.reshape(1, -1, 1) + beta.reshape(1, -1, 1)
    h = jax.nn.gelu(h, approximate=False)
    out = jax.lax.conv_general_dilated(
        h, w_oik, window_strides=(1,),
        padding=[(kernel_size // 2, kernel_size // 2)],
        dimension_numbers=("NCH", "OIH", "NCH"),
    )
    return out + b.reshape(1, -1, 1)


if __name__ == "__main__":
    N, C, Co, L, K = 4, 8, 16, 256, 3   # dim=8, dim_out=16, kernel_size=3

    key = jax.random.PRNGKey(0)
    kx, kg, kb, kw, kc = jax.random.split(key, 5)

    x = jax.random.normal(kx, (N, C, L), jnp.float32)
    # BatchNorm affine params (perturbed deterministically from torch defaults).
    gamma = 1.0 + 0.5 * jax.random.normal(kg, (C,), jnp.float32)
    beta = 0.1 * jax.random.normal(kb, (C,), jnp.float32)
    # Conv1d params (torch kaiming-uniform-style bound), deterministic.
    bound = 1.0 / math.sqrt(C * K)
    w = jax.random.uniform(kw, (Co, C, K), jnp.float32, -bound, bound)
    b = jax.random.uniform(kc, (Co,), jnp.float32, -bound, bound)

    out = jax.block_until_ready(conv_block(x, gamma, beta, w, b, kernel_size=K))
    ref = conv_block_reference(x, gamma, beta, w, b, K)

    assert out.shape == (N, Co, L)
    max_err = float(jnp.max(jnp.abs(out - ref)))
    assert jnp.allclose(out, ref, rtol=5e-5, atol=5e-5), f"max abs err {max_err}"
    print("KERNEL_OK")
</pallas_src>

<mosaic_0001>
module attributes {stable_mosaic.version = 11 : i64} {
  func.func @bn_stats_kernel(%arg0: i32, %arg1: memref<4x8x256xf32, #tpu.memory_space<vmem>>, %arg2: memref<8x1xf32, #tpu.memory_space<vmem>>, %arg3: memref<8x1xf32, #tpu.memory_space<vmem>>) attributes {dimension_semantics = [#tpu.dimension_semantics<arbitrary>], iteration_bounds = array<i64: 1>, scalar_prefetch = 0 : i64, scratch_operands = 0 : i64, tpu.core_type = #tpu.core_type<tc>, window_params = [{transform_indices = @transform_0, window_bounds = array<i64: 4, 8, 256>}, {pipeline_mode = #tpu.pipeline_mode<synchronous>, transform_indices = @transform_1, window_bounds = array<i64: 8, 1>}, {pipeline_mode = #tpu.pipeline_mode<synchronous>, transform_indices = @transform_2, window_bounds = array<i64: 8, 1>}]} {
    %c0_i32 = arith.constant 0 : i32
    %0 = arith.cmpi eq, %arg0, %c0_i32 : i32
    %1 = arith.extui %0 : i1 to i32
    %c0_i32_0 = arith.constant 0 : i32
    %2 = arith.cmpi ne, %1, %c0_i32_0 : i32
    scf.if %2 {
      %cst_14 = arith.constant 0.000000e+00 : f32
      %17 = vector.broadcast %cst_14 : f32 to vector<8x1xf32>
      %c0_15 = arith.constant 0 : index
      %c0_16 = arith.constant 0 : index
      %18 = vector.load %arg2[%c0_15, %c0_16] : memref<8x1xf32, #tpu.memory_space<vmem>>, vector<8x1xf32>
      tpu.vector_store %arg2[%c0_15, %c0_16], %17 {strides = array<i32>} : memref<8x1xf32, #tpu.memory_space<vmem>>, vector<8x1xf32>,
      %cst_17 = arith.constant 0.000000e+00 : f32
      %19 = vector.broadcast %cst_17 : f32 to vector<8x1xf32>
      %c0_18 = arith.constant 0 : index
      %c0_19 = arith.constant 0 : index
      %20 = vector.load %arg3[%c0_18, %c0_19] : memref<8x1xf32, #tpu.memory_space<vmem>>, vector<8x1xf32>
      tpu.vector_store %arg3[%c0_18, %c0_19], %19 {strides = array<i32>} : memref<8x1xf32, #tpu.memory_space<vmem>>, vector<8x1xf32>,
    } else {
    }
    %c0 = arith.constant 0 : index
    %c0_1 = arith.constant 0 : index
    %c0_2 = arith.constant 0 : index
    %3 = vector.load %arg1[%c0, %c0_1, %c0_2] : memref<4x8x256xf32, #tpu.memory_space<vmem>>, vector<4x8x256xf32>
    %cst = arith.constant dense<0.000000e+00> : vector<8x256xf32>
    %4 = vector.multi_reduction <add>, %3, %cst [0] : vector<4x8x256xf32> to vector<8x256xf32>
    %5 = arith.mulf %3, %3 : vector<4x8x256xf32>
    %cst_3 = arith.constant dense<0.000000e+00> : vector<8x256xf32>
    %6 = vector.multi_reduction <add>, %5, %cst_3 [0] : vector<4x8x256xf32> to vector<8x256xf32>
    %c0_4 = arith.constant 0 : index
    %c0_5 = arith.constant 0 : index
    %7 = vector.load %arg2[%c0_4, %c0_5] : memref<8x1xf32, #tpu.memory_space<vmem>>, vector<8x1xf32>
    %cst_6 = arith.constant dense<0.000000e+00> : vector<8xf32>
    %8 = vector.multi_reduction <add>, %4, %cst_6 [1] : vector<8x256xf32> to vector<8xf32>
    %9 = vector.shape_cast %8 : vector<8xf32> to vector<8x1xf32>
    %10 = arith.addf %7, %9 : vector<8x1xf32>
    %c0_7 = arith.constant 0 : index
    %c0_8 = arith.constant 0 : index
    %11 = vector.load %arg2[%c0_7, %c0_8] : memref<8x1xf32, #tpu.memory_space<vmem>>, vector<8x1xf32>
    tpu.vector_store %arg2[%c0_7, %c0_8], %10 {strides = array<i32>} : memref<8x1xf32, #tpu.memory_space<vmem>>, vector<8x1xf32>,
    %c0_9 = arith.constant 0 : index
    %c0_10 = arith.constant 0 : index
    %12 = vector.load %arg3[%c0_9, %c0_10] : memref<8x1xf32, #tpu.memory_space<vmem>>, vector<8x1xf32>
    %cst_11 = arith.constant dense<0.000000e+00> : vector<8xf32>
    %13 = vector.multi_reduction <add>, %6, %cst_11 [1] : vector<8x256xf32> to vector<8xf32>
    %14 = vector.shape_cast %13 : vector<8xf32> to vector<8x1xf32>
    %15 = arith.addf %12, %14 : vector<8x1xf32>
    %c0_12 = arith.constant 0 : index
    %c0_13 = arith.constant 0 : index
    %16 = vector.load %arg3[%c0_12, %c0_13] : memref<8x1xf32, #tpu.memory_space<vmem>>, vector<8x1xf32>
    tpu.vector_store %arg3[%c0_12, %c0_13], %15 {strides = array<i32>} : memref<8x1xf32, #tpu.memory_space<vmem>>, vector<8x1xf32>,
    return
  }
  func.func @transform_0(%arg0: i32) -> (i32, i32, i32) {
    %c0_i32 = arith.constant 0 : i32
    %c0_i32_0 = arith.constant 0 : i32
    %c0_i32_1 = arith.constant 0 : i32
    return %arg0, %c0_i32, %c0_i32_0 : i32, i32, i32
  }
  func.func @transform_1(%arg0: i32) -> (i32, i32) {
    %c0_i32 = arith.constant 0 : i32
    %c0_i32_0 = arith.constant 0 : i32
    %c0_i32_1 = arith.constant 0 : i32
    return %c0_i32, %c0_i32_0 : i32, i32
  }
  func.func @transform_2(%arg0: i32) -> (i32, i32) {
    %c0_i32 = arith.constant 0 : i32
    %c0_i32_0 = arith.constant 0 : i32
    %c0_i32_1 = arith.constant 0 : i32
    return %c0_i32, %c0_i32_0 : i32, i32
  }
}

module attributes {stable_mosaic.version = 11 : i64} {
  func.func @convblock_kernel(%arg0: i32, %arg1: memref<8x1xf32, #tpu.memory_space<vmem>>, %arg2: memref<8x1xf32, #tpu.memory_space<vmem>>, %arg3: memref<4x8x256xf32, #tpu.memory_space<vmem>>, %arg4: memref<16x24xf32, #tpu.memory_space<vmem>>, %arg5: memref<16x1xf32, #tpu.memory_space<vmem>>, %arg6: memref<4x16x256xf32, #tpu.memory_space<vmem>>, %arg7: memref<24x256xf32, #tpu.memory_space<vmem>>) attributes {dimension_semantics = [#tpu.dimension_semantics<parallel>], iteration_bounds = array<i64: 1>, scalar_prefetch = 0 : i64, scratch_operands = 1 : i64, tpu.core_type = #tpu.core_type<tc>, window_params = [{pipeline_mode = #tpu.pipeline_mode<synchronous>, transform_indices = @transform_0, window_bounds = array<i64: 8, 1>}, {pipeline_mode = #tpu.pipeline_mode<synchronous>, transform_indices = @transform_1, window_bounds = array<i64: 8, 1>}, {transform_indices = @transform_2, window_bounds = array<i64: 4, 8, 256>}, {pipeline_mode = #tpu.pipeline_mode<synchronous>, transform_indices = @transform_3, window_bounds = array<i64: 16, 24>}, {pipeline_mode = #tpu.pipeline_mode<synchronous>, transform_indices = @transform_4, window_bounds = array<i64: 16, 1>}, {transform_indices = @transform_5, window_bounds = array<i64: 4, 16, 256>}]} {
    %c0 = arith.constant 0 : index
    %c0_0 = arith.constant 0 : index
    %0 = vector.load %arg1[%c0, %c0_0] : memref<8x1xf32, #tpu.memory_space<vmem>>, vector<8x1xf32>
    %c0_1 = arith.constant 0 : index
    %c0_2 = arith.constant 0 : index
    %1 = vector.load %arg2[%c0_1, %c0_2] : memref<8x1xf32, #tpu.memory_space<vmem>>, vector<8x1xf32>
    %c0_3 = arith.constant 0 : index
    %c0_4 = arith.constant 0 : index
    %2 = vector.load %arg4[%c0_3, %c0_4] : memref<16x24xf32, #tpu.memory_space<vmem>>, vector<16x24xf32>
    %c0_5 = arith.constant 0 : index
    %c0_6 = arith.constant 0 : index
    %3 = vector.load %arg5[%c0_5, %c0_6] : memref<16x1xf32, #tpu.memory_space<vmem>>, vector<16x1xf32>
    %4 = tpu.iota {dimensions = array<i32: 1>} : vector<8x256xi32>
    %c1_i32 = arith.constant 1 : i32
    %5 = vector.broadcast %c1_i32 : i32 to vector<8x256xi32>
    %6 = arith.cmpi sge, %4, %5 : vector<8x256xi32>
    %c255_i32 = arith.constant 255 : i32
    %7 = vector.broadcast %c255_i32 : i32 to vector<8x256xi32>
    %8 = arith.cmpi slt, %4, %7 : vector<8x256xi32>
    %c0_7 = arith.constant 0 : index
    %c0_8 = arith.constant 0 : index
    %c0_9 = arith.constant 0 : index
    %9 = vector.load %arg3[%c0_7, %c0_8, %c0_9] : memref<4x8x256xf32, #tpu.memory_space<vmem>>, vector<1x8x256xf32>
    %10 = vector.shape_cast %9 : vector<1x8x256xf32> to vector<8x256xf32>
    %11 = vector.broadcast %0 : vector<8x1xf32> to vector<8x256xf32>
    %12 = arith.mulf %10, %11 : vector<8x256xf32>
    %13 = vector.broadcast %1 : vector<8x1xf32> to vector<8x256xf32>
    %14 = arith.addf %12, %13 : vector<8x256xf32>
    %cst = arith.constant 0.707106769 : f32
    %15 = vector.broadcast %cst : f32 to vector<8x256xf32>
    %16 = arith.mulf %14, %15 : vector<8x256xf32>
    %17 = math.absf %16 : vector<8x256xf32>
    %cst_10 = arith.constant 0.327591091 : f32
    %18 = vector.broadcast %cst_10 : f32 to vector<8x256xf32>
    %19 = arith.mulf %18, %17 : vector<8x256xf32>
    %cst_11 = arith.constant 1.000000e+00 : f32
    %20 = vector.broadcast %cst_11 : f32 to vector<8x256xf32>
    %21 = arith.addf %20, %19 : vector<8x256xf32>
    %22 = tpu.reciprocal %21 : vector<8x256xf32> -> vector<8x256xf32>
    %cst_12 = arith.constant 1.06140542 : f32
    %23 = vector.broadcast %cst_12 : f32 to vector<8x256xf32>
    %24 = arith.mulf %22, %23 : vector<8x256xf32>
    %cst_13 = arith.constant -1.45315206 : f32
    %25 = vector.broadcast %cst_13 : f32 to vector<8x256xf32>
    %26 = arith.addf %25, %24 : vector<8x256xf32>
    %27 = arith.mulf %22, %26 : vector<8x256xf32>
    %cst_14 = arith.constant 1.42141378 : f32
    %28 = vector.broadcast %cst_14 : f32 to vector<8x256xf32>
    %29 = arith.addf %28, %27 : vector<8x256xf32>
    %30 = arith.mulf %22, %29 : vector<8x256xf32>
    %cst_15 = arith.constant -0.284496725 : f32
    %31 = vector.broadcast %cst_15 : f32 to vector<8x256xf32>
    %32 = arith.addf %31, %30 : vector<8x256xf32>
    %33 = arith.mulf %22, %32 : vector<8x256xf32>
    %cst_16 = arith.constant 0.254829586 : f32
    %34 = vector.broadcast %cst_16 : f32 to vector<8x256xf32>
    %35 = arith.addf %34, %33 : vector<8x256xf32>
    %36 = arith.mulf %22, %35 : vector<8x256xf32>
    %cst_17 = arith.constant 0.000000e+00 : f32
    %37 = vector.broadcast %cst_17 : f32 to vector<8x256xf32>
    %38 = arith.subf %37, %17 : vector<8x256xf32>
    %39 = arith.mulf %38, %17 : vector<8x256xf32>
    %40 = math.exp %39 : vector<8x256xf32>
    %41 = arith.mulf %36, %40 : vector<8x256xf32>
    %cst_18 = arith.constant 1.000000e+00 : f32
    %42 = vector.broadcast %cst_18 : f32 to vector<8x256xf32>
    %43 = arith.subf %42, %41 : vector<8x256xf32>
    %cst_19 = arith.constant 0.000000e+00 : f32
    %44 = vector.broadcast %cst_19 : f32 to vector<8x256xf32>
    %45 = arith.cmpf oge, %16, %44 : vector<8x256xf32>
    %cst_20 = arith.constant 0.000000e+00 : f32
    %46 = vector.broadcast %cst_20 : f32 to vector<8x256xf32>
    %47 = arith.subf %46, %43 : vector<8x256xf32>
    %48 = arith.select %45, %43, %47 : vector<8x256xi1>, vector<8x256xf32>
    %cst_21 = arith.constant 5.000000e-01 : f32
    %49 = vector.broadcast %cst_21 : f32 to vector<8x256xf32>
    %50 = arith.mulf %49, %14 : vector<8x256xf32>
    %cst_22 = arith.constant 1.000000e+00 : f32
    %51 = vector.broadcast %cst_22 : f32 to vector<8x256xf32>
    %52 = arith.addf %51, %48 : vector<8x256xf32>
    %53 = arith.mulf %50, %52 : vector<8x256xf32>
    %c1_i32_23 = arith.constant 1 : i32
    %54 = tpu.dynamic_rotate %53 by %c1_i32_23 dim 1 : vector<8x256xf32>, i32 -> vector<8x256xf32>
    %cst_24 = arith.constant 0.000000e+00 : f32
    %55 = vector.broadcast %cst_24 : f32 to vector<8x256xf32>
    %56 = arith.select %6, %54, %55 : vector<8x256xi1>, vector<8x256xf32>
    %c0_25 = arith.constant 0 : index
    %c0_26 = arith.constant 0 : index
    %57 = vector.load %arg7[%c0_25, %c0_26] : memref<24x256xf32, #tpu.memory_space<vmem>>, vector<8x256xf32>
    tpu.vector_store %arg7[%c0_25, %c0_26], %56 {strides = array<i32>} : memref<24x256xf32, #tpu.memory_space<vmem>>, vector<8x256xf32>,
    %c8 = arith.constant 8 : index
    %c0_27 = arith.constant 0 : index
    %58 = vector.load %arg7[%c8, %c0_27] : memref<24x256xf32, #tpu.memory_space<vmem>>, vector<8x256xf32>
    tpu.vector_store %arg7[%c8, %c0_27], %53 {strides = array<i32>} : memref<24x256xf32, #tpu.memory_space<vmem>>, vector<8x256xf32>,
    %c255_i32_28 = arith.constant 255 : i32
    %59 = tpu.dynamic_rotate %53 by %c255_i32_28 dim 1 : vector<8x256xf32>, i32 -> vector<8x256xf32>
    %cst_29 = arith.constant 0.000000e+00 : f32
    %60 = vector.broadcast %cst_29 : f32 to vector<8x256xf32>
    %61 = arith.select %8, %59, %60 : vector<8x256xi1>, vector<8x256xf32>
    %c16 = arith.constant 16 : index
    %c0_30 = arith.constant 0 : index
    %62 = vector.load %arg7[%c16, %c0_30] : memref<24x256xf32, #tpu.memory_space<vmem>>, vector<8x256xf32>
    tpu.vector_store %arg7[%c16, %c0_30], %61 {strides = array<i32>} : memref<24x256xf32, #tpu.memory_space<vmem>>, vector<8x256xf32>,
    %c0_31 = arith.constant 0 : index
    %c0_32 = arith.constant 0 : index
    %63 = vector.load %arg7[%c0_31, %c0_32] : memref<24x256xf32, #tpu.memory_space<vmem>>, vector<24x256xf32>
    %cst_33 = arith.constant dense<0.000000e+00> : vector<16x256xf32>
    %64 = tpu.matmul %2, %63, %cst_33 {dimension_numbers = #tpu.dot_dimension_numbers<[1], [0], [0], [1], [0, 0, 1, 1], [], []>} : vector<16x24xf32>, vector<24x256xf32>, vector<16x256xf32> -> vector<16x256xf32>
    %65 = vector.broadcast %3 : vector<16x1xf32> to vector<16x256xf32>
    %66 = arith.addf %64, %65 : vector<16x256xf32>
    %c0_34 = arith.constant 0 : index
    %c0_35 = arith.constant 0 : index
    %c0_36 = arith.constant 0 : index
    %67 = vector.load %arg6[%c0_34, %c0_35, %c0_36] : memref<4x16x256xf32, #tpu.memory_space<vmem>>, vector<1x16x256xf32>
    %68 = vector.shape_cast %67 : vector<1x16x256xf32> to vector<16x256xf32>
    %69 = vector.shape_cast %66 : vector<16x256xf32> to vector<1x16x256xf32>
    tpu.vector_store %arg6[%c0_34, %c0_35, %c0_36], %69 {strides = array<i32>} : memref<4x16x256xf32, #tpu.memory_space<vmem>>, vector<1x16x256xf32>,
    %c1 = arith.constant 1 : index
    %c0_37 = arith.constant 0 : index
    %c0_38 = arith.constant 0 : index
    %70 = vector.load %arg3[%c1, %c0_37, %c0_38] : memref<4x8x256xf32, #tpu.memory_space<vmem>>, vector<1x8x256xf32>
    %71 = vector.shape_cast %70 : vector<1x8x256xf32> to vector<8x256xf32>
    %72 = vector.broadcast %0 : vector<8x1xf32> to vector<8x256xf32>
    %73 = arith.mulf %71, %72 : vector<8x256xf32>
    %74 = vector.broadcast %1 : vector<8x1xf32> to vector<8x256xf32>
    %75 = arith.addf %73, %74 : vector<8x256xf32>
    %cst_39 = arith.constant 0.707106769 : f32
    %76 = vector.broadcast %cst_39 : f32 to vector<8x256xf32>
    %77 = arith.mulf %75, %76 : vector<8x256xf32>
    %78 = math.absf %77 : vector<8x256xf32>
    %cst_40 = arith.constant 0.327591091 : f32
    %79 = vector.broadcast %cst_40 : f32 to vector<8x256xf32>
    %80 = arith.mulf %79, %78 : vector<8x256xf32>
    %cst_41 = arith.constant 1.000000e+00 : f32
    %81 = vector.broadcast %cst_41 : f32 to vector<8x256xf32>
    %82 = arith.addf %81, %80 : vector<8x256xf32>
    %83 = tpu.reciprocal %82 : vector<8x256xf32> -> vector<8x256xf32>
    %cst_42 = arith.constant 1.06140542 : f32
    %84 = vector.broadcast %cst_42 : f32 to vector<8x256xf32>
    %85 = arith.mulf %83, %84 : vector<8x256xf32>
    %cst_43 = arith.constant -1.45315206 : f32
    %86 = vector.broadcast %cst_43 : f32 to vector<8x256xf32>
    %87 = arith.addf %86, %85 : vector<8x256xf32>
    %88 = arith.mulf %83, %87 : vector<8x256xf32>
    %cst_44 = arith.constant 1.42141378 : f32
    %89 = vector.broadcast %cst_44 : f32 to vector<8x256xf32>
    %90 = arith.addf %89, %88 : vector<8x256xf32>
    %91 = arith.mulf %83, %90 : vector<8x256xf32>
    %cst_45 = arith.constant -0.284496725 : f32
    %92 = vector.broadcast %cst_45 : f32 to vector<8x256xf32>
    %93 = arith.addf %92, %91 : vector<8x256xf32>
    %94 = arith.mulf %83, %93 : vector<8x256xf32>
    %cst_46 = arith.constant 0.254829586 : f32
    %95 = vector.broadcast %cst_46 : f32 to vector<8x256xf32>
    %96 = arith.addf %95, %94 : vector<8x256xf32>
    %97 = arith.mulf %83, %96 : vector<8x256xf32>
    %cst_47 = arith.constant 0.000000e+00 : f32
    %98 = vector.broadcast %cst_47 : f32 to vector<8x256xf32>
    %99 = arith.subf %98, %78 : vector<8x256xf32>
    %100 = arith.mulf %99, %78 : vector<8x256xf32>
    %101 = math.exp %100 : vector<8x256xf32>
    %102 = arith.mulf %97, %101 : vector<8x256xf32>
    %cst_48 = arith.constant 1.000000e+00 : f32
    %103 = vector.broadcast %cst_48 : f32 to vector<8x256xf32>
    %104 = arith.subf %103, %102 : vector<8x256xf32>
    %cst_49 = arith.constant 0.000000e+00 : f32
    %105 = vector.broadcast %cst_49 : f32 to vector<8x256xf32>
    %106 = arith.cmpf oge, %77, %105 : vector<8x256xf32>
    %cst_50 = arith.constant 0.000000e+00 : f32
    %107 = vector.broadcast %cst_50 : f32 to vector<8x256xf32>
    %108 = arith.subf %107, %104 : vector<8x256xf32>
    %109 = arith.select %106, %104, %108 : vector<8x256xi1>, vector<8x256xf32>
    %cst_51 = arith.constant 5.000000e-01 : f32
    %110 = vector.broadcast %cst_51 : f32 to vector<8x256xf32>
    %111 = arith.mulf %110, %75 : vector<8x256xf32>
    %cst_52 = arith.constant 1.000000e+00 : f32
    %112 = vector.broadcast %cst_52 : f32 to vector<8x256xf32>
    %113 = arith.addf %112, %109 : vector<8x256xf32>
    %114 = arith.mulf %111, %113 : vector<8x256xf32>
    %c1_i32_53 = arith.constant 1 : i32
    %115 = tpu.dynamic_rotate %114 by %c1_i32_53 dim 1 : vector<8x256xf32>, i32 -> vector<8x256xf32>
    %cst_54 = arith.constant 0.000000e+00 : f32
    %116 = vector.broadcast %cst_54 : f32 to vector<8x256xf32>
    %117 = arith.select %6, %115, %116 : vector<8x256xi1>, vector<8x256xf32>
    %c0_55 = arith.constant 0 : index
    %c0_56 = arith.constant 0 : index
    %118 = vector.load %arg7[%c0_55, %c0_56] : memref<24x256xf32, #tpu.memory_space<vmem>>, vector<8x256xf32>
    tpu.vector_store %arg7[%c0_55, %c0_56], %117 {strides = array<i32>} : memref<24x256xf32, #tpu.memory_space<vmem>>, vector<8x256xf32>,
    %c8_57 = arith.constant 8 : index
    %c0_58 = arith.constant 0 : index
    %119 = vector.load %arg7[%c8_57, %c0_58] : memref<24x256xf32, #tpu.memory_space<vmem>>, vector<8x256xf32>
    tpu.vector_store %arg7[%c8_57, %c0_58], %114 {strides = array<i32>} : memref<24x256xf32, #tpu.memory_space<vmem>>, vector<8x256xf32>,
    %c255_i32_59 = arith.constant 255 : i32
    %120 = tpu.dynamic_rotate %114 by %c255_i32_59 dim 1 : vector<8x256xf32>, i32 -> vector<8x256xf32>
    %cst_60 = arith.constant 0.000000e+00 : f32
    %121 = vector.broadcast %cst_60 : f32 to vector<8x256xf32>
    %122 = arith.select %8, %120, %121 : vector<8x256xi1>, vector<8x256xf32>
    %c16_61 = arith.constant 16 : index
    %c0_62 = arith.constant 0 : index
    %123 = vector.load %arg7[%c16_61, %c0_62] : memref<24x256xf32, #tpu.memory_space<vmem>>, vector<8x256xf32>
    tpu.vector_store %arg7[%c16_61, %c0_62], %122 {strides = array<i32>} : memref<24x256xf32, #tpu.memory_space<vmem>>, vector<8x256xf32>,
    %c0_63 = arith.constant 0 : index
    %c0_64 = arith.constant 0 : index
    %124 = vector.load %arg7[%c0_63, %c0_64] : memref<24x256xf32, #tpu.memory_space<vmem>>, vector<24x256xf32>
    %cst_65 = arith.constant dense<0.000000e+00> : vector<16x256xf32>
    %125 = tpu.matmul %2, %124, %cst_65 {dimension_numbers = #tpu.dot_dimension_numbers<[1], [0], [0], [1], [0, 0, 1, 1], [], []>} : vector<16x24xf32>, vector<24x256xf32>, vector<16x256xf32> -> vector<16x256xf32>
    %126 = vector.broadcast %3 : vector<16x1xf32> to vector<16x256xf32>
    %127 = arith.addf %125, %126 : vector<16x256xf32>
    %c1_66 = arith.constant 1 : index
    %c0_67 = arith.constant 0 : index
    %c0_68 = arith.constant 0 : index
    %128 = vector.load %arg6[%c1_66, %c0_67, %c0_68] : memref<4x16x256xf32, #tpu.memory_space<vmem>>, vector<1x16x256xf32>
    %129 = vector.shape_cast %128 : vector<1x16x256xf32> to vector<16x256xf32>
    %130 = vector.shape_cast %127 : vector<16x256xf32> to vector<1x16x256xf32>
    tpu.vector_store %arg6[%c1_66, %c0_67, %c0_68], %130 {strides = array<i32>} : memref<4x16x256xf32, #tpu.memory_space<vmem>>, vector<1x16x256xf32>,
    %c2 = arith.constant 2 : index
    %c0_69 = arith.constant 0 : index
    %c0_70 = arith.constant 0 : index
    %131 = vector.load %arg3[%c2, %c0_69, %c0_70] : memref<4x8x256xf32, #tpu.memory_space<vmem>>, vector<1x8x256xf32>
    %132 = vector.shape_cast %131 : vector<1x8x256xf32> to vector<8x256xf32>
    %133 = vector.broadcast %0 : vector<8x1xf32> to vector<8x256xf32>
    %134 = arith.mulf %132, %133 : vector<8x256xf32>
    %135 = vector.broadcast %1 : vector<8x1xf32> to vector<8x256xf32>
    %136 = arith.addf %134, %135 : vector<8x256xf32>
    %cst_71 = arith.constant 0.707106769 : f32
    %137 = vector.broadcast %cst_71 : f32 to vector<8x256xf32>
    %138 = arith.mulf %136, %137 : vector<8x256xf32>
    %139 = math.absf %138 : vector<8x256xf32>
    %cst_72 = arith.constant 0.327591091 : f32
    %140 = vector.broadcast %cst_72 : f32 to vector<8x256xf32>
    %141 = arith.mulf %140, %139 : vector<8x256xf32>
    %cst_73 = arith.constant 1.000000e+00 : f32
    %142 = vector.broadcast %cst_73 : f32 to vector<8x256xf32>
    %143 = arith.addf %142, %141 : vector<8x256xf32>
    %144 = tpu.reciprocal %143 : vector<8x256xf32> -> vector<8x256xf32>
    %cst_74 = arith.constant 1.06140542 : f32
    %145 = vector.broadcast %cst_74 : f32 to vector<8x256xf32>
    %146 = arith.mulf %144, %145 : vector<8x256xf32>
    %cst_75 = arith.constant -1.45315206 : f32
    %147 = vector.broadcast %cst_75 : f32 to vector<8x256xf32>
    %148 = arith.addf %147, %146 : vector<8x256xf32>
    %149 = arith.mulf %144, %148 : vector<8x256xf32>
    %cst_76 = arith.constant 1.42141378 : f32
    %150 = vector.broadcast %cst_76 : f32 to vector<8x256xf32>
    %151 = arith.addf %150, %149 : vector<8x256xf32>
    %152 = arith.mulf %144, %151 : vector<8x256xf32>
    %cst_77 = arith.constant -0.284496725 : f32
    %153 = vector.broadcast %cst_77 : f32 to vector<8x256xf32>
    %154 = arith.addf %153, %152 : vector<8x256xf32>
    %155 = arith.mulf %144, %154 : vector<8x256xf32>
    %cst_78 = arith.constant 0.254829586 : f32
    %156 = vector.broadcast %cst_78 : f32 to vector<8x256xf32>
    %157 = arith.addf %156, %155 : vector<8x256xf32>
    %158 = arith.mulf %144, %157 : vector<8x256xf32>
    %cst_79 = arith.constant 0.000000e+00 : f32
    %159 = vector.broadcast %cst_79 : f32 to vector<8x256xf32>
    %160 = arith.subf %159, %139 : vector<8x256xf32>
    %161 = arith.mulf %160, %139 : vector<8x256xf32>
    %162 = math.exp %161 : vector<8x256xf32>
    %163 = arith.mulf %158, %162 : vector<8x256xf32>
    %cst_80 = arith.constant 1.000000e+00 : f32
    %164 = vector.broadcast %cst_80 : f32 to vector<8x256xf32>
    %165 = arith.subf %164, %163 : vector<8x256xf32>
    %cst_81 = arith.constant 0.000000e+00 : f32
    %166 = vector.broadcast %cst_81 : f32 to vector<8x256xf32>
    %167 = arith.cmpf oge, %138, %166 : vector<8x256xf32>
    %cst_82 = arith.constant 0.000000e+00 : f32
    %168 = vector.broadcast %cst_82 : f32 to vector<8x256xf32>
    %169 = arith.subf %168, %165 : vector<8x256xf32>
    %170 = arith.select %167, %165, %169 : vector<8x256xi1>, vector<8x256xf32>
    %cst_83 = arith.constant 5.000000e-01 : f32
    %171 = vector.broadcast %cst_83 : f32 to vector<8x256xf32>
    %172 = arith.mulf %171, %136 : vector<8x256xf32>
    %cst_84 = arith.constant 1.000000e+00 : f32
    %173 = vector.broadcast %cst_84 : f32 to vector<8x256xf32>
    %174 = arith.addf %173, %170 : vector<8x256xf32>
    %175 = arith.mulf %172, %174 : vector<8x256xf32>
    %c1_i32_85 = arith.constant 1 : i32
    %176 = tpu.dynamic_rotate %175 by %c1_i32_85 dim 1 : vector<8x256xf32>, i32 -> vector<8x256xf32>
    %cst_86 = arith.constant 0.000000e+00 : f32
    %177 = vector.broadcast %cst_86 : f32 to vector<8x256xf32>
    %178 = arith.select %6, %176, %177 : vector<8x256xi1>, vector<8x256xf32>
    %c0_87 = arith.constant 0 : index
    %c0_88 = arith.constant 0 : index
    %179 = vector.load %arg7[%c0_87, %c0_88] : memref<24x256xf32, #tpu.memory_space<vmem>>, vector<8x256xf32>
    tpu.vector_store %arg7[%c0_87, %c0_88], %178 {strides = array<i32>} : memref<24x256xf32, #tpu.memory_space<vmem>>, vector<8x256xf32>,
    %c8_89 = arith.constant 8 : index
    %c0_90 = arith.constant 0 : index
    %180 = vector.load %arg7[%c8_89, %c0_90] : memref<24x256xf32, #tpu.memory_space<vmem>>, vector<8x256xf32>
    tpu.vector_store %arg7[%c8_89, %c0_90], %175 {strides = array<i32>} : memref<24x256xf32, #tpu.memory_space<vmem>>, vector<8x256xf32>,
    %c255_i32_91 = arith.constant 255 : i32
    %181 = tpu.dynamic_rotate %175 by %c255_i32_91 dim 1 : vector<8x256xf32>, i32 -> vector<8x256xf32>
    %cst_92 = arith.constant 0.000000e+00 : f32
    %182 = vector.broadcast %cst_92 : f32 to vector<8x256xf32>
    %183 = arith.select %8, %181, %182 : vector<8x256xi1>, vector<8x256xf32>
    %c16_93 = arith.constant 16 : index
    %c0_94 = arith.constant 0 : index
    %184 = vector.load %arg7[%c16_93, %c0_94] : memref<24x256xf32, #tpu.memory_space<vmem>>, vector<8x256xf32>
    tpu.vector_store %arg7[%c16_93, %c0_94], %183 {strides = array<i32>} : memref<24x256xf32, #tpu.memory_space<vmem>>, vector<8x256xf32>,
    %c0_95 = arith.constant 0 : index
    %c0_96 = arith.constant 0 : index
    %185 = vector.load %arg7[%c0_95, %c0_96] : memref<24x256xf32, #tpu.memory_space<vmem>>, vector<24x256xf32>
    %cst_97 = arith.constant dense<0.000000e+00> : vector<16x256xf32>
    %186 = tpu.matmul %2, %185, %cst_97 {dimension_numbers = #tpu.dot_dimension_numbers<[1], [0], [0], [1], [0, 0, 1, 1], [], []>} : vector<16x24xf32>, vector<24x256xf32>, vector<16x256xf32> -> vector<16x256xf32>
    %187 = vector.broadcast %3 : vector<16x1xf32> to vector<16x256xf32>
    %188 = arith.addf %186, %187 : vector<16x256xf32>
    %c2_98 = arith.constant 2 : index
    %c0_99 = arith.constant 0 : index
    %c0_100 = arith.constant 0 : index
    %189 = vector.load %arg6[%c2_98, %c0_99, %c0_100] : memref<4x16x256xf32, #tpu.memory_space<vmem>>, vector<1x16x256xf32>
    %190 = vector.shape_cast %189 : vector<1x16x256xf32> to vector<16x256xf32>
    %191 = vector.shape_cast %188 : vector<16x256xf32> to vector<1x16x256xf32>
    tpu.vector_store %arg6[%c2_98, %c0_99, %c0_100], %191 {strides = array<i32>} : memref<4x16x256xf32, #tpu.memory_space<vmem>>, vector<1x16x256xf32>,
    %c3 = arith.constant 3 : index
    %c0_101 = arith.constant 0 : index
    %c0_102 = arith.constant 0 : index
    %192 = vector.load %arg3[%c3, %c0_101, %c0_102] : memref<4x8x256xf32, #tpu.memory_space<vmem>>, vector<1x8x256xf32>
    %193 = vector.shape_cast %192 : vector<1x8x256xf32> to vector<8x256xf32>
    %194 = vector.broadcast %0 : vector<8x1xf32> to vector<8x256xf32>
    %195 = arith.mulf %193, %194 : vector<8x256xf32>
    %196 = vector.broadcast %1 : vector<8x1xf32> to vector<8x256xf32>
    %197 = arith.addf %195, %196 : vector<8x256xf32>
    %cst_103 = arith.constant 0.707106769 : f32
    %198 = vector.broadcast %cst_103 : f32 to vector<8x256xf32>
    %199 = arith.mulf %197, %198 : vector<8x256xf32>
    %200 = math.absf %199 : vector<8x256xf32>
    %cst_104 = arith.constant 0.327591091 : f32
    %201 = vector.broadcast %cst_104 : f32 to vector<8x256xf32>
    %202 = arith.mulf %201, %200 : vector<8x256xf32>
    %cst_105 = arith.constant 1.000000e+00 : f32
    %203 = vector.broadcast %cst_105 : f32 to vector<8x256xf32>
    %204 = arith.addf %203, %202 : vector<8x256xf32>
    %205 = tpu.reciprocal %204 : vector<8x256xf32> -> vector<8x256xf32>
    %cst_106 = arith.constant 1.06140542 : f32
    %206 = vector.broadcast %cst_106 : f32 to vector<8x256xf32>
    %207 = arith.mulf %205, %206 : vector<8x256xf32>
    %cst_107 = arith.constant -1.45315206 : f32
    %208 = vector.broadcast %cst_107 : f32 to vector<8x256xf32>
    %209 = arith.addf %208, %207 : vector<8x256xf32>
    %210 = arith.mulf %205, %209 : vector<8x256xf32>
    %cst_108 = arith.constant 1.42141378 : f32
    %211 = vector.broadcast %cst_108 : f32 to vector<8x256xf32>
    %212 = arith.addf %211, %210 : vector<8x256xf32>
    %213 = arith.mulf %205, %212 : vector<8x256xf32>
    %cst_109 = arith.constant -0.284496725 : f32
    %214 = vector.broadcast %cst_109 : f32 to vector<8x256xf32>
    %215 = arith.addf %214, %213 : vector<8x256xf32>
    %216 = arith.mulf %205, %215 : vector<8x256xf32>
    %cst_110 = arith.constant 0.254829586 : f32
    %217 = vector.broadcast %cst_110 : f32 to vector<8x256xf32>
    %218 = arith.addf %217, %216 : vector<8x256xf32>
    %219 = arith.mulf %205, %218 : vector<8x256xf32>
    %cst_111 = arith.constant 0.000000e+00 : f32
    %220 = vector.broadcast %cst_111 : f32 to vector<8x256xf32>
    %221 = arith.subf %220, %200 : vector<8x256xf32>
    %222 = arith.mulf %221, %200 : vector<8x256xf32>
    %223 = math.exp %222 : vector<8x256xf32>
    %224 = arith.mulf %219, %223 : vector<8x256xf32>
    %cst_112 = arith.constant 1.000000e+00 : f32
    %225 = vector.broadcast %cst_112 : f32 to vector<8x256xf32>
    %226 = arith.subf %225, %224 : vector<8x256xf32>
    %cst_113 = arith.constant 0.000000e+00 : f32
    %227 = vector.broadcast %cst_113 : f32 to vector<8x256xf32>
    %228 = arith.cmpf oge, %199, %227 : vector<8x256xf32>
    %cst_114 = arith.constant 0.000000e+00 : f32
    %229 = vector.broadcast %cst_114 : f32 to vector<8x256xf32>
    %230 = arith.subf %229, %226 : vector<8x256xf32>
    %231 = arith.select %228, %226, %230 : vector<8x256xi1>, vector<8x256xf32>
    %cst_115 = arith.constant 5.000000e-01 : f32
    %232 = vector.broadcast %cst_115 : f32 to vector<8x256xf32>
    %233 = arith.mulf %232, %197 : vector<8x256xf32>
    %cst_116 = arith.constant 1.000000e+00 : f32
    %234 = vector.broadcast %cst_116 : f32 to vector<8x256xf32>
    %235 = arith.addf %234, %231 : vector<8x256xf32>
    %236 = arith.mulf %233, %235 : vector<8x256xf32>
    %c1_i32_117 = arith.constant 1 : i32
    %237 = tpu.dynamic_rotate %236 by %c1_i32_117 dim 1 : vector<8x256xf32>, i32 -> vector<8x256xf32>
    %cst_118 = arith.constant 0.000000e+00 : f32
    %238 = vector.broadcast %cst_118 : f32 to vector<8x256xf32>
    %239 = arith.select %6, %237, %238 : vector<8x256xi1>, vector<8x256xf32>
    %c0_119 = arith.constant 0 : index
    %c0_120 = arith.constant 0 : index
    %240 = vector.load %arg7[%c0_119, %c0_120] : memref<24x256xf32, #tpu.memory_space<vmem>>, vector<8x256xf32>
    tpu.vector_store %arg7[%c0_119, %c0_120], %239 {strides = array<i32>} : memref<24x256xf32, #tpu.memory_space<vmem>>, vector<8x256xf32>,
    %c8_121 = arith.constant 8 : index
    %c0_122 = arith.constant 0 : index
    %241 = vector.load %arg7[%c8_121, %c0_122] : memref<24x256xf32, #tpu.memory_space<vmem>>, vector<8x256xf32>
    tpu.vector_store %arg7[%c8_121, %c0_122], %236 {strides = array<i32>} : memref<24x256xf32, #tpu.memory_space<vmem>>, vector<8x256xf32>,
    %c255_i32_123 = arith.constant 255 : i32
    %242 = tpu.dynamic_rotate %236 by %c255_i32_123 dim 1 : vector<8x256xf32>, i32 -> vector<8x256xf32>
    %cst_124 = arith.constant 0.000000e+00 : f32
    %243 = vector.broadcast %cst_124 : f32 to vector<8x256xf32>
    %244 = arith.select %8, %242, %243 : vector<8x256xi1>, vector<8x256xf32>
    %c16_125 = arith.constant 16 : index
    %c0_126 = arith.constant 0 : index
    %245 = vector.load %arg7[%c16_125, %c0_126] : memref<24x256xf32, #tpu.memory_space<vmem>>, vector<8x256xf32>
    tpu.vector_store %arg7[%c16_125, %c0_126], %244 {strides = array<i32>} : memref<24x256xf32, #tpu.memory_space<vmem>>, vector<8x256xf32>,
    %c0_127 = arith.constant 0 : index
    %c0_128 = arith.constant 0 : index
    %246 = vector.load %arg7[%c0_127, %c0_128] : memref<24x256xf32, #tpu.memory_space<vmem>>, vector<24x256xf32>
    %cst_129 = arith.constant dense<0.000000e+00> : vector<16x256xf32>
    %247 = tpu.matmul %2, %246, %cst_129 {dimension_numbers = #tpu.dot_dimension_numbers<[1], [0], [0], [1], [0, 0, 1, 1], [], []>} : vector<16x24xf32>, vector<24x256xf32>, vector<16x256xf32> -> vector<16x256xf32>
    %248 = vector.broadcast %3 : vector<16x1xf32> to vector<16x256xf32>
    %249 = arith.addf %247, %248 : vector<16x256xf32>
    %c3_130 = arith.constant 3 : index
    %c0_131 = arith.constant 0 : index
    %c0_132 = arith.constant 0 : index
    %250 = vector.load %arg6[%c3_130, %c0_131, %c0_132] : memref<4x16x256xf32, #tpu.memory_space<vmem>>, vector<1x16x256xf32>
    %251 = vector.shape_cast %250 : vector<1x16x256xf32> to vector<16x256xf32>
    %252 = vector.shape_cast %249 : vector<16x256xf32> to vector<1x16x256xf32>
    tpu.vector_store %arg6[%c3_130, %c0_131, %c0_132], %252 {strides = array<i32>} : memref<4x16x256xf32, #tpu.memory_space<vmem>>, vector<1x16x256xf32>,
    return
  }
  func.func @transform_0(%arg0: i32) -> (i32, i32) {
    %c0_i32 = arith.constant 0 : i32
    %c0_i32_0 = arith.constant 0 : i32
    %c0_i32_1 = arith.constant 0 : i32
    return %c0_i32, %c0_i32_0 : i32, i32
  }
  func.func @transform_1(%arg0: i32) -> (i32, i32) {
    %c0_i32 = arith.constant 0 : i32
    %c0_i32_0 = arith.constant 0 : i32
    %c0_i32_1 = arith.constant 0 : i32
    return %c0_i32, %c0_i32_0 : i32, i32
  }
  func.func @transform_2(%arg0: i32) -> (i32, i32, i32) {
    %c0_i32 = arith.constant 0 : i32
    %c0_i32_0 = arith.constant 0 : i32
    %c0_i32_1 = arith.constant 0 : i32
    return %arg0, %c0_i32, %c0_i32_0 : i32, i32, i32
  }
  func.func @transform_3(%arg0: i32) -> (i32, i32) {
    %c0_i32 = arith.constant 0 : i32
    %c0_i32_0 = arith.constant 0 : i32
    %c0_i32_1 = arith.constant 0 : i32
    return %c0_i32, %c0_i32_0 : i32, i32
  }
  func.func @transform_4(%arg0: i32) -> (i32, i32) {
    %c0_i32 = arith.constant 0 : i32
    %c0_i32_0 = arith.constant 0 : i32
    %c0_i32_1 = arith.constant 0 : i32
    return %c0_i32, %c0_i32_0 : i32, i32
  }
  func.func @transform_5(%arg0: i32) -> (i32, i32, i32) {
    %c0_i32 = arith.constant 0 : i32
    %c0_i32_0 = arith.constant 0 : i32
    %c0_i32_1 = arith.constant 0 : i32
    return %arg0, %c0_i32, %c0_i32_0 : i32, i32, i32
  }
}

</mosaic_0001>

<bundles_post_ra>
// kernel: conv_block.2
= control target key start
LH: loop header
LB: loop body
LE: loop exit
PB: predicated region body
PF: predicated region fallthrough
CT: control target
= control target key end

     0   :  { %vm14_vm0 = vcmask 7168   ;;  %v67_v3 = vmov 0.0   ;;  %s129_s0 = inlined_call_operand.vmem [shape: f32[4,8,256], index: 0, kind: input, shape index: {}]   ;;  %s130_s1 = inlined_call_operand.vmem [shape: f32[8,1], index: 1, kind: output, shape index: {0}]   ;;  %s131_s2 = inlined_call_operand.vmem [shape: f32[8,1], index: 2, kind: output, shape index: {1}]  }
   0x1   :  { %v17_v0 = vld [vmem:[%s129_s0] sm:$0xff]  ;;  %v18_v1 = vld [vmem:[%s129_s0 + $0x8] sm:$0xff]  ;;  %v19_v2 = vld [vmem:[%s129_s0 + $0x10] sm:$0xff]  ;;  %15 = vst.msk [vmem:[%s130_s1] sm:$0xff] %vm14_vm0, %v67_v3 }
   0x2   :  { %v20_v4 = vld [vmem:[%s129_s0 + $0x18] sm:$0xff]  ;;  %v21_v5 = vld [vmem:[%s129_s0 + $0x20] sm:$0xff]  ;;  %v22_v6 = vld [vmem:[%s129_s0 + $0x28] sm:$0xff]  ;;  %v25_v7 = vadd.f32 %v19_v2, %v17_v0  ;;  %v31_v8 = vmul.f32 %v17_v0, %v17_v0  ;;  %v32_v9 = vmul.f32 %v18_v1, %v18_v1  ;;  %v33_v10 = vmul.f32 %v19_v2, %v19_v2  ;;  %16 = vst.msk [vmem:[%s131_s2] sm:$0xff] %vm14_vm0, %v67_v3 }
   0x3   :  { %v23_v11 = vld [vmem:[%s129_s0 + $0x30] sm:$0xff]  ;;  %v28_v12 = vadd.f32 %v20_v4, %v18_v1  ;;  %v34_v13 = vmul.f32 %v20_v4, %v20_v4  ;;  %v35_v14 = vmul.f32 %v21_v5, %v21_v5  ;;  %v36_v15 = vmul.f32 %v22_v6, %v22_v6  ;;  %v24_v16 = vld [vmem:[%s129_s0 + $0x38] sm:$0xff] }
   0x4   :  { %v26_v17 = vadd.f32 %v25_v7, %v21_v5  ;;  %v37_v18 = vmul.f32 %v23_v11, %v23_v11  ;;  %v39_v19 = vadd.f32 %v33_v10, %v31_v8  ;;  %v38_v21 = vmul.f32 %v24_v16, %v24_v16 }
   0x5   :  { %v29_v20 = vadd.f32 %v28_v12, %v22_v6  ;;  %v42_v22 = vadd.f32 %v34_v13, %v32_v9 }
   0x6   :  { %v27_v23 = vadd.f32 %v26_v17, %v23_v11  ;;  %v40_v24 = vadd.f32 %v39_v19, %v35_v14 }
   0x7   :  { %v30_v25 = vadd.f32 %v29_v20, %v24_v16  ;;  %v43_v26 = vadd.f32 %v42_v22, %v36_v15 }
   0x8   :  { %v41_v27 = vadd.f32 %v40_v24, %v37_v18  ;;  %v45_v31 = vld [vmem:[%s130_s1] sm:$0xff] }
   0x9   :  { %v46_v28 = vadd.f32 %v30_v25, %v27_v23  ;;  %v44_v29 = vadd.f32 %v43_v26, %v38_v21  ;;  %v52_v34 = vld [vmem:[%s131_s2] sm:$0xff] }
   0xb   :  { %47 = vadd.xlane.f32.xlu0 %v46_v28  ;;  %v53_v30 = vadd.f32 %v44_v29, %v41_v27 }
   0xf   :  { %54 = vadd.xlane.f32.xlu0 %v53_v30 }
  0x98   :  { %v48_v32 = vpop.xlane.xlu0 %47 }
  0x99   :  { %v49_v33 = vadd.f32 %v48_v32, %v45_v31 }
  0x9b   :  { %51 = vst.msk [vmem:[%s130_s1] sm:$0xff] %vm14_vm0, %v49_v33 }
  0x9c   :  { %v55_v35 = vpop.xlane.xlu0 %54 }
  0x9d   :  { %v56_v36 = vadd.f32 %v55_v35, %v52_v34 }
  0x9f   :  { %57 = vst.msk [vmem:[%s131_s2] sm:$0xff] %vm14_vm0, %v56_v36 }

// kernel: conv_block.3
= control target key start
LH: loop header
LB: loop body
LE: loop exit
PB: predicated region body
PF: predicated region fallthrough
CT: control target
= control target key end

     0   :  { %s1226_s0 = inlined_call_operand.vmem [shape: f32[8,1], index: 0, kind: input, shape index: {}]   ;;  %s1227_s1 = inlined_call_operand.vmem [shape: f32[8,1], index: 1, kind: input, shape index: {}]   ;;  %s1228_s2 = inlined_call_operand.vmem [shape: f32[4,8,256], index: 2, kind: input, shape index: {}]   ;;  %s1229_s3 = inlined_call_operand.vmem [shape: f32[16,24], index: 3, kind: input, shape index: {}]   ;;  %s1230_s4 = inlined_call_operand.vmem [shape: f32[16,1], index: 4, kind: input, shape index: {}]   ;;  %s1231_s5 = inlined_call_operand.hbm [shape: f32[4,16,256], index: 5, kind: output, shape index: {}]  }
   0x1   :  { %v21_v0 = vld [vmem:[%s1226_s0] sm:$0xff] }
   0x2   :  { %10 = vsyncpa [#allocation4], 0  ;;  %v881_v1 = vmov 0   ;;  %v22_v2 = vld [vmem:[%s1227_s1] sm:$0xff]  ;;  %v35_v5 = vld [vmem:[%s1228_s2 + $0x8] sm:$0xff]  ;;  %s883_s11 = smov 1  }
   0x3   :  { %803 = vset.pattern.permute.xlu0 %v881_v1  ;;  %824 = vset.pattern.permute.xlu1 %v881_v1  ;;  %v34_v3 = vld [vmem:[%s1228_s2] sm:$0xff]  ;;  %v755_v6 = vld [vmem:[%s1228_s2 + $0x10] sm:$0xff]  ;;  %v756_v7 = vld [vmem:[%s1228_s2 + $0x18] sm:$0xff]  ;;  %vm885_vm10 = vmmov 1   ;;  %vm142_vm14 = vcmask 195584  }
   0x4   :  { %38 = vperm.xlu0 %803, %v21_v0   ;;  %v759_v17 = vld [vmem:[%s1228_s2 + $0x20] sm:$0xff]  ;;  %v760_v20 = vld [vmem:[%s1228_s2 + $0x28] sm:$0xff]  ;;  %v763_v29 = vld [vmem:[%s1228_s2 + $0x30] sm:$0xff] }
   0x5   :  { %v764_v42 = vld [vmem:[%s1228_s2 + $0x38] sm:$0xff]  ;;  %s882_s2 = smov 127  }
   0x8   :  { %45 = vperm.xlu0 %803, %v22_v2  }
  0x83   :  { %v39_v4 = vpop.permute.xlu0 %38 }
  0x84   :  { %v41_v8 = vmul.f32 %v39_v4, %v34_v3  ;;  %v42_v9 = vmul.f32 %v39_v4, %v35_v5  ;;  %v233_v10 = vmul.f32 %v755_v6, %v39_v4  ;;  %v234_v11 = vmul.f32 %v756_v7, %v39_v4 }
  0x85   :  { %v402_v25 = vmul.f32 %v759_v17, %v39_v4  ;;  %v403_v28 = vmul.f32 %v760_v20, %v39_v4  ;;  %v571_v38 = vmul.f32 %v763_v29, %v39_v4  ;;  %v572_v49 = vmul.f32 %v764_v42, %v39_v4 }
  0x87   :  { %v46_v12 = vpop.permute.xlu0 %45 }
  0x88   :  { %v48_v13 = vadd.f32 %v46_v12, %v41_v8  ;;  %v49_v14 = vadd.f32 %v46_v12, %v42_v9  ;;  %v235_v15 = vadd.f32 %v233_v10, %v46_v12  ;;  %v236_v16 = vadd.f32 %v234_v11, %v46_v12 }
  0x89   :  { %v958_v32 = vadd.f32 %v402_v25, %v46_v12  ;;  %v960_v34 = vadd.f32 %v403_v28, %v46_v12  ;;  %v965_v41 = vadd.f32 %v571_v38, %v46_v12  ;;  %v978_v55 = vadd.f32 %v572_v49, %v46_v12 }
  0x8a   :  { %v940_v18 = vmul.f32 0.70710677, %v48_v13  ;;  %v942_v19 = vmul.f32 0.70710677, %v49_v14  ;;  %v947_v21 = vmul.f32 0.70710677, %v235_v15 }
  0x8b   :  { %v949_v22 = vmul.f32 0.70710677, %v236_v16  ;;  %v963_v40 = vmul.f32 0.70710677, %v958_v32  ;;  %v971_v43 = vmul.f32 0.70710677, %v960_v34 }
  0x8c   :  { %v52_v23 = vand.u32 2147483647, %v940_v18  ;;  %v53_v24 = vand.u32 2147483647, %v942_v19  ;;  %v239_v26 = vand.u32 2147483647, %v947_v21 }
  0x8d   :  { %v240_v27 = vand.u32 2147483647, %v949_v22  ;;  %v408_v46 = vand.u32 2147483647, %v963_v40  ;;  %v409_v48 = vand.u32 2147483647, %v971_v43 }
  0x8e   :  { %v54_v30 = vmul.f32 0.3275911, %v52_v23  ;;  %v55_v31 = vmul.f32 0.3275911, %v53_v24  ;;  %v241_v33 = vmul.f32 0.3275911, %v239_v26 }
  0x8f   :  { %v242_v37 = vmul.f32 0.3275911, %v240_v27  ;;  %v78_v44 = vsub.f32 0.0, %v52_v23  ;;  %v79_v47 = vsub.f32 0.0, %v53_v24  ;;  %v265_v50 = vsub.f32 0.0, %v239_v26 }
  0x90   :  { %v56_v35 = vadd.f32 1.0, %v54_v30  ;;  %v57_v36 = vadd.f32 1.0, %v55_v31  ;;  %v243_v39 = vadd.f32 1.0, %v241_v33  ;;  %v410_v51 = vmul.f32 0.3275911, %v408_v46 }
  0x91   :  { %v244_v45 = vadd.f32 1.0, %v242_v37  ;;  %v976_v52 = vmul.f32 0.70710677, %v965_v41  ;;  %v266_v53 = vsub.f32 0.0, %v240_v27  ;;  %v411_v54 = vmul.f32 0.3275911, %v409_v48 }
  0x92   :  { %825 = vrcp.f32 %v56_v35  ;;  %v80_v56 = vmul.f32 %v78_v44, %v52_v23  ;;  %v412_v57 = vadd.f32 1.0, %v410_v51  ;;  %v981_v59 = vmul.f32 0.5, %v48_v13 }
  0x93   :  { %827 = vrcp.f32 %v57_v36  ;;  %v577_v58 = vand.u32 2147483647, %v976_v52  ;;  %v81_v60 = vmul.f32 %v79_v47, %v53_v24  ;;  %v983_v61 = vmul.f32 0.5, %v49_v14 }
  0x94   :  { %829 = vrcp.f32 %v243_v39  ;;  %v413_v62 = vadd.f32 1.0, %v411_v54  ;;  %v267_v63 = vmul.f32 %v265_v50, %v239_v26  ;;  %v434_v0 = vsub.f32 0.0, %v408_v46 }
  0x95   :  { %831 = vrcp.f32 %v244_v45  ;;  %v579_v1 = vmul.f32 0.3275911, %v577_v58  ;;  %v985_v2 = vmul.f32 0.5, %v235_v15  ;;  %v268_v3 = vmul.f32 %v266_v53, %v240_v27 }
  0x96   :  { %833 = vrcp.f32 %v412_v57  ;;  %v988_v4 = vmul.f32 0.70710677, %v978_v55  ;;  %v82_v6 = vmul.f32 1.442695, %v80_v56  ;;  %v992_v7 = vmul.f32 0.5, %v236_v16 }
  0x97   :  { %835 = vrcp.f32 %v413_v62  ;;  %v435_v8 = vsub.f32 0.0, %v409_v48  ;;  %v581_v9 = vadd.f32 1.0, %v579_v1  ;;  %v84_v12 = vmul.f32 1.442695, %v81_v60 }
  0x98   :  { %v578_v13 = vand.u32 2147483647, %v988_v4  ;;  %v269_v15 = vmul.f32 1.442695, %v267_v63  ;;  %v436_v17 = vmul.f32 %v434_v0, %v408_v46  ;;  %v271_v23 = vmul.f32 1.442695, %v268_v3 }
  0x99   :  { %837 = vrcp.f32 %v581_v9  ;;  %v437_v26 = vmul.f32 %v435_v8, %v409_v48  ;;  %v603_v27 = vsub.f32 0.0, %v577_v58  ;;  %vm90_vm0 = vcmp.ge.f32.partialorder %v940_v18, 0.0 }
  0x9a   :  { %v580_v24 = vmul.f32 0.3275911, %v578_v13  ;;  %839 = vpow2.f32 %v82_v6  ;;  %v438_v35 = vmul.f32 1.442695, %v436_v17  ;;  %v604_v36 = vsub.f32 0.0, %v578_v13 }
  0x9b   :  { %841 = vpow2.f32 %v84_v12  ;;  %v440_v45 = vmul.f32 1.442695, %v437_v26  ;;  %v605_v46 = vmul.f32 %v603_v27, %v577_v58  ;;  %vm91_vm1 = vcmp.ge.f32.partialorder %v942_v19, 0.0 }
  0x9c   :  { %v990_v5 = vpop.eup %825  ;;  %v582_v30 = vadd.f32 1.0, %v580_v24  ;;  %843 = vpow2.f32 %v269_v15  ;;  %v606_v56 = vmul.f32 %v604_v36, %v578_v13  ;;  %vm277_vm2 = vcmp.ge.f32.partialorder %v947_v21, 0.0 }
  0x9d   :  { %v994_v10 = vpop.eup %827  ;;  %v60_v11 = vmul.f32 1.0614054, %v990_v5  ;;  %v607_v3 = vmul.f32 1.442695, %v605_v46  ;;  %vm278_vm3 = vcmp.ge.f32.partialorder %v949_v22, 0.0  ;;  %vm446_vm4 = vcmp.ge.f32.partialorder %v963_v40, 0.0 }
  0x9e   :  { %v61_v14 = vmul.f32 1.0614054, %v994_v10  ;;  %v999_v25 = vpop.eup %829  ;;  %845 = vrcp.f32 %v582_v30  ;;  %v609_v17 = vmul.f32 1.442695, %v606_v56  ;;  %vm447_vm5 = vcmp.ge.f32.partialorder %v971_v43, 0.0 }
  0x9f   :  { %v62_v20 = vadd.f32 -1.4531521, %v60_v11  ;;  %v247_v29 = vmul.f32 1.0614054, %v999_v25  ;;  %v1003_v31 = vpop.eup %831  ;;  %847 = vpow2.f32 %v271_v23  ;;  %vm615_vm6 = vcmp.ge.f32.partialorder %v976_v52, 0.0 }
  0xa0   :  { %v63_v16 = vadd.f32 -1.4531521, %v61_v14  ;;  %v248_v39 = vmul.f32 1.0614054, %v1003_v31  ;;  %v1007_v42 = vpop.eup %833  ;;  %849 = vpow2.f32 %v438_v35  ;;  %vm616_vm7 = vcmp.ge.f32.partialorder %v988_v4, 0.0 }
  0xa1   :  { %v64_v28 = vmul.f32 %v990_v5, %v62_v20  ;;  %v249_v38 = vadd.f32 -1.4531521, %v247_v29  ;;  %v1009_v47 = vpop.eup %835  ;;  %v416_v51 = vmul.f32 1.0614054, %v1007_v42  ;;  %851 = vpow2.f32 %v440_v45 }
  0xa2   :  { %v65_v33 = vmul.f32 %v994_v10, %v63_v16  ;;  %v250_v50 = vadd.f32 -1.4531521, %v248_v39  ;;  %v417_v54 = vmul.f32 1.0614054, %v1009_v47  ;;  %853 = vpow2.f32 %v607_v3 }
  0xa3   :  { %v66_v37 = vadd.f32 1.4214138, %v64_v28  ;;  %v251_v49 = vmul.f32 %v999_v25, %v249_v38  ;;  %v418_v58 = vadd.f32 -1.4531521, %v416_v51  ;;  %v1017_v63 = vpop.eup %837  ;;  %855 = vpow2.f32 %v609_v17 }
  0xa4   :  { %v67_v44 = vadd.f32 1.4214138, %v65_v33  ;;  %v252_v62 = vmul.f32 %v1003_v31, %v250_v50  ;;  %v419_v1 = vadd.f32 -1.4531521, %v417_v54  ;;  %v840_v12 = vpop.eup %839  ;;  %v585_v15 = vmul.f32 1.0614054, %v1017_v63 }
  0xa5   :  { %v68_v48 = vmul.f32 %v990_v5, %v66_v37  ;;  %v253_v60 = vadd.f32 1.4214138, %v251_v49  ;;  %v420_v11 = vmul.f32 %v1007_v42, %v418_v58  ;;  %v842_v20 = vpop.eup %841  ;;  %v27_v4 = vlaneseq }
  0xa6   :  { %v69_v53 = vmul.f32 %v994_v10, %v67_v44  ;;  %v254_v9 = vadd.f32 1.4214138, %v252_v62  ;;  %v421_v14 = vmul.f32 %v1009_v47, %v419_v1  ;;  %v844_v27 = vpop.eup %843  ;;  %v587_v30 = vadd.f32 -1.4531521, %v585_v15 }
  0xa7   :  { %v70_v57 = vadd.f32 -0.28449672, %v68_v48  ;;  %v255_v8 = vmul.f32 %v999_v25, %v253_v60  ;;  %v422_v26 = vadd.f32 1.4214138, %v420_v11 }
  0xa8   :  { %v71_v0 = vadd.f32 -0.28449672, %v69_v53  ;;  %v256_v16 = vmul.f32 %v1003_v31, %v254_v9  ;;  %v423_v29 = vadd.f32 1.4214138, %v421_v14  ;;  %v1027_v33 = vpop.eup %845  ;;  %v589_v46 = vmul.f32 %v1017_v63, %v587_v30 }
  0xa9   :  { %v72_v6 = vmul.f32 %v990_v5, %v70_v57  ;;  %v257_v24 = vadd.f32 -0.28449672, %v255_v8  ;;  %v424_v38 = vmul.f32 %v1007_v42, %v422_v26  ;;  %v848_v39 = vpop.eup %847  ;;  %v586_v48 = vmul.f32 1.0614054, %v1027_v33 }
  0xaa   :  { %v73_v13 = vmul.f32 %v994_v10, %v71_v0  ;;  %v258_v37 = vadd.f32 -0.28449672, %v256_v16  ;;  %v425_v45 = vmul.f32 %v1009_v47, %v423_v29  ;;  %v850_v53 = vpop.eup %849  ;;  %v591_v57 = vadd.f32 1.4214138, %v589_v46 }
  0xab   :  { %v74_v23 = vadd.f32 0.2548296, %v72_v6  ;;  %v259_v36 = vmul.f32 %v999_v25, %v257_v24  ;;  %v426_v51 = vadd.f32 -0.28449672, %v424_v38  ;;  %v588_v60 = vadd.f32 -1.4531521, %v586_v48  ;;  %v852_v1 = vpop.eup %851 }
  0xac   :  { %v75_v28 = vadd.f32 0.2548296, %v73_v13  ;;  %v427_v56 = vadd.f32 -0.28449672, %v425_v45  ;;  %v593_v8 = vmul.f32 %v1017_v63, %v591_v57  ;;  %v452_v57 = vmul.f32 0.5, %v958_v32 }
  0xad   :  { %v76_v35 = vmul.f32 %v990_v5, %v74_v23  ;;  %v261_v50 = vadd.f32 0.2548296, %v259_v36  ;;  %v260_v5 = vmul.f32 %v1003_v31, %v258_v37  ;;  %v428_v0 = vmul.f32 %v1007_v42, %v426_v51 }
  0xae   :  { %v77_v44 = vmul.f32 %v994_v10, %v75_v28  ;;  %v429_v6 = vmul.f32 %v1009_v47, %v427_v56  ;;  %v854_v28 = vpop.eup %853 }
  0xaf   :  { %v86_v49 = vmul.f32 %v840_v12, %v76_v35  ;;  %v263_v10 = vmul.f32 %v999_v25, %v261_v50  ;;  %v262_v58 = vadd.f32 0.2548296, %v260_v5  ;;  %v430_v13 = vadd.f32 0.2548296, %v428_v0  ;;  %v856_v5 = vpop.eup %855 }
  0xb0   :  { %v87_v54 = vmul.f32 %v842_v20, %v77_v44  ;;  %v431_v15 = vadd.f32 0.2548296, %v429_v6  ;;  %v595_v25 = vadd.f32 -0.28449672, %v593_v8  ;;  %v590_v20 = vmul.f32 %v1027_v33, %v588_v60 }
  0xb1   :  { %v88_v62 = vsub.f32 1.0, %v86_v49  ;;  %v273_v11 = vmul.f32 %v844_v27, %v263_v10  ;;  %v264_v12 = vmul.f32 %v1003_v31, %v262_v58  ;;  %v432_v26 = vmul.f32 %v1007_v42, %v430_v13 }
  0xb2   :  { %v89_v3 = vsub.f32 1.0, %v87_v54  ;;  %v433_v31 = vmul.f32 %v1009_v47, %v431_v15  ;;  %v597_v27 = vmul.f32 %v1017_v63, %v595_v25  ;;  %v592_v44 = vadd.f32 1.4214138, %v590_v20 }
  0xb3   :  { %v92_v9 = vsub.f32 0.0, %v88_v62  ;;  %v275_v24 = vsub.f32 1.0, %v273_v11  ;;  %v274_v16 = vmul.f32 %v848_v39, %v264_v12  ;;  %v442_v37 = vmul.f32 %v850_v53, %v432_v26 }
  0xb4   :  { %v93_v14 = vsub.f32 0.0, %v89_v3  ;;  %v443_v38 = vmul.f32 %v852_v1, %v433_v31  ;;  %v599_v39 = vadd.f32 0.2548296, %v597_v27  ;;  %v594_v49 = vmul.f32 %v1027_v33, %v592_v44 }
  0xb5   :  { %v94_v23 = vsel %vm90_vm0, %v88_v62, %v92_v9  ;;  %v279_v35 = vsub.f32 0.0, %v275_v24  ;;  %v276_v36 = vsub.f32 1.0, %v274_v16  ;;  %v444_v47 = vsub.f32 1.0, %v442_v37 }
  0xb6   :  { %v98_v29 = vadd.f32 1.0, %v94_v23  ;;  %v95_v17 = vsel %vm91_vm1, %v89_v3, %v93_v14  ;;  %v445_v48 = vsub.f32 1.0, %v443_v38  ;;  %v596_v22 = vadd.f32 -0.28449672, %v594_v49 }
  0xb7   :  { %v99_v30 = vadd.f32 1.0, %v95_v17  ;;  %v281_v19 = vsel %vm277_vm2, %v275_v24, %v279_v35  ;;  %v280_v45 = vsub.f32 0.0, %v276_v36  ;;  %v448_v21 = vsub.f32 0.0, %v444_v47 }
  0xb8   :  { %v1054_v18 = vmul.f32 %v98_v29, %v981_v59  ;;  %v285_v46 = vadd.f32 1.0, %v281_v19  ;;  %v601_v59 = vmul.f32 %v1017_v63, %v599_v39  ;;  %v449_v54 = vsub.f32 0.0, %v445_v48 }
  0xb9   :  { %v1057_v42 = vmul.f32 %v99_v30, %v983_v61  ;;  %v282_v61 = vsel %vm278_vm3, %v276_v36, %v280_v45  ;;  %v450_v63 = vsel %vm446_vm4, %v444_v47, %v448_v21  ;;  %v453_v10 = vmul.f32 0.5, %v960_v34  ;;  %v23_v21 = vld [vmem:[%s1229_s3] sm:$0xff] }
  0xba   :  { %115 = vrot.lane.b32.xlu0 %v1054_v18, %s882_s2  ;;  %v1071_v51 = vmul.f32 %v285_v46, %v985_v2  ;;  %v286_v53 = vadd.f32 1.0, %v282_v61  ;;  %v611_v56 = vmul.f32 %v854_v28, %v601_v59  ;;  %v451_v2 = vsel %vm447_vm5, %v445_v48, %v449_v54 }
  0xbb   :  { %v804_v50 = vpack.i.bf16 %v1057_v42, %v1054_v18  ;;  %v454_v60 = vadd.f32 1.0, %v450_v63  ;;  %v455_v58 = vadd.f32 1.0, %v451_v2  ;;  %v598_v0 = vmul.f32 %v1027_v33, %v596_v22  ;;  %v24_v22 = vld [vmem:[%s1229_s3 + $0x8] sm:$0xff]  ;;  %s886_s3 = smov [#allocation3]  }
  0xbc   :  { %v1079_v40 = vmul.f32 %v286_v53, %v992_v7  ;;  %v613_v62 = vsub.f32 1.0, %v611_v56  ;;  %v884_v7 = vmov 0.0   ;;  %v621_v14 = vmul.f32 0.5, %v965_v41  ;;  %v25_v41 = vld [vmem:[%s1230_s4] sm:$0xff]  ;;  %s742_s19 = sshll.u32 %s886_s3, 4  ;;  %s743_s19 = int_to_ptr.vmem [resolvable:$true] %s742_s19 }
  0xbd   :  { %805 = vrot.lane.b32.xlu1 %v804_v50, %s883_s11  ;;  %v1085_v1 = vmul.f32 %v454_v60, %v452_v57  ;;  %v1087_v3 = vmul.f32 %v455_v58, %v453_v10  ;;  %v600_v6 = vadd.f32 0.2548296, %v598_v0  ;;  %213 = vmatprep.mubr.f32.mxu0 %v884_v7  ;;  %v622_v25 = vmul.f32 0.5, %v978_v55  ;;  %v26_v55 = vld [vmem:[%s1230_s4 + $0x8] sm:$0xff]  ;;  %s857_s20 = scalar_lea.vmem %s743_s19, 2048  ;;  %p862_p1 = scmp.lt.s32.totalorder %s743_s19, %s743_s19 }
  0xbe   :  { %301 = vrot.lane.b32.xlu0 %v1071_v51, %s882_s2  ;;  %v809_v43 = vpack.i.bf16 %v1079_v40, %v1071_v51  ;;  %v617_v32 = vsub.f32 0.0, %v613_v62  ;;  %381 = vmatprep.mubr.f32.mxu1 %v884_v7  ;;  %v1125_v16 = vand.u32 127, %v27_v4  ;;  %p858_p0 = scmp.ne.s32.totalorder %s743_s19, %s857_s20  ;;  %p863_p2 = scmp.lt.s32.totalorder %s857_s20, %s857_s20 }
  0xbf   :  { %v814_v34 = vpack.i.bf16 %v1087_v3, %v1085_v1  ;;  %v602_v8 = vmul.f32 %v1027_v33, %v600_v6 }
  0xc0   :  { %v619_v9 = vsel %vm615_vm6, %v613_v62, %v617_v32  ;;  %vm106_vm8 = vcmp.lt.s32.totalorder %v1125_v16, 1  ;;  %vm30_vm9 = vcmp.ge.s32.totalorder %v1125_v16, 1  ;;  %v1140_v38 = vadd.s32 128, %v1125_v16  ;;  %p864_p3 = por %p863_p2, %p862_p1 }
  0xc1   :  { %810 = vrot.lane.b32.xlu1 %v809_v43, %s883_s11  ;;  %v612_v11 = vmul.f32 %v856_v5, %v602_v8  ;;  %v623_v12 = vadd.f32 1.0, %v619_v9  ;;  %vm1135_vm11 = vmpackc.low %vm885_vm10, %vm30_vm9  ;;  %vm119_vm12 = vcmp.lt.s32.totalorder %v1125_v16, 127 }
  0xc2   :  { %815 = vrot.lane.b32.xlu0 %v814_v34, %s883_s11  ;;  %vm33_vm13 = vcmp.lt.s32.totalorder %v1140_v38, 255  ;;  %p865_p4 = pnand %p864_p3, %p858_p0 }
  0xc3   :  { %v614_v13 = vsub.f32 1.0, %v612_v11  ;;  %v1105_v52 = vmul.f32 %v623_v12, %v621_v14 }
  0xc5   :  { %117 = vrot.lane.b32.xlu1 %v1057_v42, %s882_s2  ;;  %v618_v15 = vsub.f32 0.0, %v614_v13 }
  0xc6   :  { %470 = vrot.lane.b32.xlu0 %v1085_v1, %s882_s2 }
  0xc7   :  { %v620_v33 = vsel %vm616_vm7, %v614_v13, %v618_v15 }
  0xc8   :  { %v624_v20 = vadd.f32 1.0, %v620_v33 }
  0xc9   :  { %303 = vrot.lane.b32.xlu1 %v1079_v40, %s882_s2 }
  0xca   :  { %639 = vrot.lane.b32.xlu0 %v1105_v52, %s882_s2  ;;  %v1110_v23 = vmul.f32 %v624_v20, %v622_v25 }
  0xcc   :  { %v819_v24 = vpack.i.bf16 %v1110_v23, %v1105_v52 }
  0xce   :  { %134 = vperm.xlu0 %803, %v25_v41   ;;  %820 = vrot.lane.b32.xlu1 %v819_v24, %s883_s11 }
  0xd2   :  { %472 = vrot.lane.b32.xlu1 %v1087_v3, %s882_s2 }
  0xd6   :  { %641 = vrot.lane.b32.xlu1 %v1110_v23, %s882_s2 }
  0xda   :  { %139 = vperm.xlu1 %824, %v26_v55  }
 0x12c   :  { %v116_v26 = vpop.permute.xlu0 %115 }
 0x12f   :  { %v806_v28 = vpop.permute.xlu1 %805 }
 0x130   :  { %v808_v29 = vunpack.i.h.bf16 %v806_v28  ;;  %v807_v17 = vunpack.i.l.bf16 %v806_v28  ;;  %v302_v31 = vpop.permute.xlu0 %301 }
 0x132   :  { %v107_v27 = vsel %vm106_vm8, %v807_v17, %v808_v29  ;;  %v108_v30 = vsel %vm106_vm8, %v808_v29, %v807_v17 }
 0x133   :  { %v775_v35 = vpack.c.bf16 %v1057_v42, %v107_v27  ;;  %v777_v36 = vpack.c.bf16 %v1054_v18, %v108_v30  ;;  %v811_v39 = vpop.permute.xlu1 %810 }
 0x134   :  { %v813_v44 = vunpack.i.h.bf16 %v811_v39  ;;  %v812_v19 = vunpack.i.l.bf16 %v811_v39  ;;  %v816_v42 = vpop.permute.xlu0 %815 }
 0x135   :  { %776 = vmatprep.subr.bf16.mxu0 %v775_v35  ;;  %v818_v47 = vunpack.i.h.bf16 %v816_v42  ;;  %v817_v46 = vunpack.i.l.bf16 %v816_v42 }
 0x136   :  { %779 = vmatpush1.bf16.msk.msra.mxu0 %vm1135_vm11, %v777_v36  ;;  %v293_v18 = vsel %vm106_vm8, %v812_v19, %v813_v44  ;;  %v294_v45 = vsel %vm106_vm8, %v813_v44, %v812_v19 }
 0x137   :  { %v118_v48 = vpop.permute.xlu1 %117  ;;  %v780_v59 = vpack.c.bf16 %v1079_v40, %v293_v18  ;;  %v782_v49 = vpack.c.bf16 %v1071_v51, %v294_v45  ;;  %v463_v5 = vsel %vm106_vm8, %v818_v47, %v817_v46  ;;  %v462_v51 = vsel %vm106_vm8, %v817_v46, %v818_v47 }
 0x138   :  { %v121_v50 = vsel %vm119_vm12, %v118_v48, %v116_v26  ;;  %v120_v61 = vsel %vm119_vm12, %v116_v26, %v118_v48  ;;  %v787_v53 = vpack.c.bf16 %v1085_v1, %v463_v5  ;;  %v785_v54 = vpack.c.bf16 %v1087_v3, %v462_v51  ;;  %v471_v62 = vpop.permute.xlu0 %470 }
 0x139   :  { %768 = vmatprep.subr.msk.mxu0 %vm33_vm13, %v121_v50  ;;  %781 = vmatprep.subr.bf16.mxu1 %v780_v59 }
 0x13a   :  { %154 = vmatpush1.msra.mxu0 %v120_v61  ;;  %784 = vmatpush1.bf16.msk.msra.mxu1 %vm1135_vm11, %v782_v49 }
 0x13b   :  { %753 = vmatmul.mubr.msk.f32.vlgmr.msra.gmra.mrb[0].mxu0 %vm142_vm14, %v23_v21  ;;  %v304_v56 = vpop.permute.xlu1 %303  ;;  %786 = vmatprep.subr.bf16.mxu0 %v785_v54 }
 0x13c   :  { %v306_v63 = vsel %vm119_vm12, %v304_v56, %v302_v31  ;;  %v305_v57 = vsel %vm119_vm12, %v302_v31, %v304_v56  ;;  %219 = vmatprep.mubr.f32.mxu0 %v884_v7  ;;  %789 = vmatpush1.bf16.msk.msra.mxu0 %vm1135_vm11, %v787_v53  ;;  %v640_v6 = vpop.permute.xlu0 %639 }
 0x13d   :  { %770 = vmatprep.subr.msk.mxu1 %vm33_vm13, %v306_v63 }
 0x13e   :  { %322 = vmatpush1.msra.mxu1 %v305_v57 }
 0x13f   :  { %757 = vmatmul.mubr.msk.f32.vlgmr.msra.gmra.mrb[0].mxu1 %vm142_vm14, %v23_v21  ;;  %754 = vmatmul.mubr.msk.f32.gmra.mrb[2].mxu0 %vm142_vm14, %v24_v22 }
 0x140   :  { %387 = vmatprep.mubr.f32.mxu1 %v884_v7  ;;  %550 = vmatprep.mubr.f32.mxu0 %v884_v7  ;;  %v821_v40 = vpop.permute.xlu1 %820 }
 0x141   :  { %v823_v2 = vunpack.i.h.bf16 %v821_v40  ;;  %v822_v60 = vunpack.i.l.bf16 %v821_v40 }
 0x143   :  { %758 = vmatmul.mubr.msk.f32.gmra.mrb[2].mxu1 %vm142_vm14, %v24_v22  ;;  %v632_v10 = vsel %vm106_vm8, %v823_v2, %v822_v60  ;;  %v631_v58 = vsel %vm106_vm8, %v822_v60, %v823_v2 }
 0x144   :  { %719 = vmatprep.mubr.f32.mxu1 %v884_v7  ;;  %v792_v0 = vpack.c.bf16 %v1105_v52, %v632_v10  ;;  %v473_v43 = vpop.permute.xlu1 %472  ;;  %v790_v1 = vpack.c.bf16 %v1110_v23, %v631_v58 }
 0x145   :  { %v474_v32 = vsel %vm119_vm12, %v471_v62, %v473_v43  ;;  %v475_v3 = vsel %vm119_vm12, %v473_v43, %v471_v62 }
 0x146   :  { %772 = vmatprep.subr.msk.mxu0 %vm33_vm13, %v475_v3  ;;  %791 = vmatprep.subr.bf16.mxu1 %v790_v1 }
 0x147   :  { %491 = vmatpush1.msra.mxu0 %v474_v32  ;;  %794 = vmatpush1.bf16.msk.msra.mxu1 %vm1135_vm11, %v792_v0 }
 0x148   :  { %761 = vmatmul.mubr.msk.f32.vlgmr.msra.gmra.mrb[4].mxu0 %vm142_vm14, %v23_v21  ;;  %v642_v34 = vpop.permute.xlu1 %641 }
 0x149   :  { %v643_v8 = vsel %vm119_vm12, %v640_v6, %v642_v34  ;;  %v644_v9 = vsel %vm119_vm12, %v642_v34, %v640_v6  ;;  %556 = vmatprep.mubr.f32.mxu0 %v884_v7 }
 0x14a   :  { %774 = vmatprep.subr.msk.mxu1 %vm33_vm13, %v644_v9 }
 0x14b   :  { %660 = vmatpush1.msra.mxu1 %v643_v8 }
 0x14c   :  { %765 = vmatmul.mubr.msk.f32.vlgmr.msra.gmra.mrb[4].mxu1 %vm142_vm14, %v23_v21  ;;  %762 = vmatmul.mubr.msk.f32.gmra.mrb[6].mxu0 %vm142_vm14, %v24_v22 }
 0x14d   :  { %725 = vmatprep.mubr.f32.mxu1 %v884_v7  ;;  %v135_v11 = vpop.permute.xlu0 %134 }
 0x150   :  { %766 = vmatmul.mubr.msk.f32.gmra.mrb[6].mxu1 %vm142_vm14, %v24_v22 }
 0x159   :  { %v140_v52 = vpop.permute.xlu1 %139 }
 0x20e   :  { %v215_v12 = vpop.f32.mrb[0].mxu0 }
 0x20f   :  { %v216_v13 = vadd.f32 %v215_v12, %v135_v11  ;;  %v217_v14 = vpop.f32.mrb[1].mxu0 }
 0x210   :  { %v218_v15 = vadd.f32 %v217_v14, %v135_v11 }
 0x211   :  { %226 = vst [vmem:[#allocation3] sm:$0xff] %v216_v13 }
 0x212   :  { %227 = vst [vmem:[#allocation3 + $0x8] sm:$0xff] %v218_v15  ;;  %v383_v33 = vpop.f32.mrb[0].mxu1  ;;  %v221_v25 = vpop.f32.mrb[2].mxu0 }
 0x213   :  { %v384_v20 = vadd.f32 %v383_v33, %v135_v11  ;;  %v385_v23 = vpop.f32.mrb[1].mxu1  ;;  %v223_v41 = vpop.f32.mrb[3].mxu0  ;;  %v222_v24 = vadd.f32 %v221_v25, %v140_v52 }
 0x214   :  { %v386_v55 = vadd.f32 %v385_v23, %v135_v11  ;;  %v224_v4 = vadd.f32 %v223_v41, %v140_v52 }
 0x215   :  { %395 = vst [vmem:[#allocation3 + $0x20] sm:$0xff] %v384_v20  ;;  %228 = vst [vmem:[#allocation3 + $0x10] sm:$0xff] %v222_v24 }
 0x216   :  { %396 = vst [vmem:[#allocation3 + $0x28] sm:$0xff] %v386_v55  ;;  %v389_v7 = vpop.f32.mrb[2].mxu1  ;;  %229 = vst [vmem:[#allocation3 + $0x18] sm:$0xff] %v224_v4 }
 0x217   :  { %v390_v16 = vadd.f32 %v389_v7, %v140_v52  ;;  %v391_v26 = vpop.f32.mrb[3].mxu1 }
 0x218   :  { %v392_v28 = vadd.f32 %v391_v26, %v140_v52 }
 0x219   :  { %397 = vst [vmem:[#allocation3 + $0x30] sm:$0xff] %v390_v16 }
 0x21a   :  { %398 = vst [vmem:[#allocation3 + $0x38] sm:$0xff] %v392_v28 }
 0x21b   :  { %v552_v29 = vpop.f32.mrb[4].mxu0 }
 0x21c   :  { %v553_v17 = vadd.f32 %v552_v29, %v135_v11  ;;  %v554_v31 = vpop.f32.mrb[5].mxu0 }
 0x21d   :  { %v555_v27 = vadd.f32 %v554_v31, %v135_v11 }
 0x21e   :  { %564 = vst [vmem:[#allocation3 + $0x40] sm:$0xff] %v553_v17 }
 0x21f   :  { %565 = vst [vmem:[#allocation3 + $0x48] sm:$0xff] %v555_v27  ;;  %v721_v30 = vpop.f32.mrb[4].mxu1  ;;  %v558_v35 = vpop.f32.mrb[6].mxu0 }
 0x220   :  { %v722_v36 = vadd.f32 %v721_v30, %v135_v11  ;;  %v723_v37 = vpop.f32.mrb[5].mxu1  ;;  %v559_v38 = vadd.f32 %v558_v35, %v140_v52  ;;  %v560_v39 = vpop.f32.mrb[7].mxu0 }
 0x221   :  { %v724_v44 = vadd.f32 %v723_v37, %v135_v11  ;;  %v561_v19 = vadd.f32 %v560_v39, %v140_v52 }
 0x222   :  { %733 = vst [vmem:[#allocation3 + $0x60] sm:$0xff] %v722_v36  ;;  %566 = vst [vmem:[#allocation3 + $0x50] sm:$0xff] %v559_v38 }
 0x223   :  { %734 = vst [vmem:[#allocation3 + $0x68] sm:$0xff] %v724_v44  ;;  %v727_v42 = vpop.f32.mrb[6].mxu1  ;;  %567 = vst [vmem:[#allocation3 + $0x58] sm:$0xff] %v561_v19 }
 0x224   :  { %v728_v18 = vadd.f32 %v727_v42, %v140_v52  ;;  %v729_v45 = vpop.f32.mrb[7].mxu1 }
 0x225   :  { %v730_v47 = vadd.f32 %v729_v45, %v140_v52 }
 0x226   :  { %735 = vst [vmem:[#allocation3 + $0x70] sm:$0xff] %v728_v18 }
 0x227   :  { %736 = vst [vmem:[#allocation3 + $0x78] sm:$0xff] %v730_v47 }
 0x228   :  { %868 = shalt.err (!%p865_p4)
}
 0x229   :  { %s869_s23 = scalar_lea.hbm %s1231_s5, 2048 }
 0x22a   :  { %p870_p5 = scmp.ne.s32.totalorder %s1231_s5, %s869_s23  ;;  %p873_p6 = scmp.lt.u32.totalorder %s869_s23, %s1231_s5 }
 0x22c   :  { %p875_p7 = pnand %p873_p6, %p870_p5 }
 0x22e   :  { %878 = shalt.err (!%p875_p7)
}
 0x22f   :  { %s887_s27 = smov 256   ;;  %s888_s28 = smov 16  }
 0x230   :  { %748 = dma.vmem_to_hbm [thread:$0]  %s743_s19, 2048, %s1231_s5, [#allocation4], %s887_s27, %s887_s27, %s888_s28  }
 0x231   :  { %879 = dma.done.wait [#allocation4], 2048  }
 0x232   :  { %880 = vsyncadd [#allocation4], 4294965248 }
 0x233   :  { %752 = vsyncpa [#allocation4], 1 }

</bundles_post_ra>
